<compile_context>
chip_gen: v7x
topology: tpu7x:2x2x1
jax: 0.10.0
libtpu: 0.0.40
codegen_flags: <defaults>
</compile_context>

<pallas_src>
import functools

import jax
import jax.numpy as jnp
from jax import lax
from jax.experimental import pallas as pl
from jax.experimental.pallas import tpu as pltpu

FEATURES_LENGTH = 256   # cfg.BACKBONE.FEATURES_LENGTH (small synthetic choice)
H1 = 512
H2 = 32
H3 = 1


def _mlp_kernel(x_ref, w1_ref, b1_ref, w2_ref, b2_ref, w3_ref, b3_ref, o_ref):
    # fc1 -> relu (dropout1 is identity at inference).
    # bf16 inputs to the MXU, f32 accumulation; bias + relu in f32 on the VPU.
    h1 = jnp.dot(x_ref[...].astype(jnp.bfloat16), w1_ref[...],
                 preferred_element_type=jnp.float32)
    # Fuse the bf16 cast into the epilogue: the (tm, 512) intermediate is the
    # widest one, materializing it in bf16 halves its VMEM traffic into fc2.
    h1 = jnp.maximum(h1 + b1_ref[...], 0.0).astype(jnp.bfloat16)

    # fc2 -> relu (dropout2 is identity at inference).
    h2 = jnp.dot(h1, w2_ref[...], preferred_element_type=jnp.float32)
    h2 = jnp.maximum(h2 + b2_ref[...], 0.0)

    # fc3 -> sigmoid.  Contract the 32-axis of h2 against the (1, 32) weight
    # row so the result is lane-dense (1, tm): full-width vst on the output
    # instead of tm/8 masked 1-lane stores.  fc3 FLOPs are negligible.
    z = lax.dot_general(w3_ref[...], h2,
                        dimension_numbers=(((1,), (1,)), ((), ())),
                        preferred_element_type=jnp.float32) + b3_ref[...]
    o_ref[...] = (1.0 / (1.0 + jnp.exp(-z))).astype(o_ref.dtype)


def _round_up(x, m):
    return ((x + m - 1) // m) * m


def _num_tensorcores():
    """2 on v7x (megacore sharding of the 'parallel' grid axis), else 1."""
    try:
        kind = jax.devices()[0].device_kind.lower()
    except Exception:
        return 1
    return 2 if ("v7" in kind or "7x" in kind) else 1


def _row_tile(m, block_m, n_cores):
    """Row-tile size.

    Invariant for the lane-dense (1, tm) output block: tm is either a multiple
    of 128 or equal to the full row count M (full-extent block).

    v5e/v6e (1 TensorCore): biggest tile that fits block_m -- per-grid-step
    overhead (~0.35 us) and full 128-wide MXU passes matter, core-sharding
    buys nothing.
    v7x (2 TensorCores): even number of equal, 128-aligned tiles so the
    'parallel' axis splits evenly across both cores.
    """
    assert block_m >= 128 and block_m % 128 == 0
    if m <= block_m and (n_cores <= 1 or m < 256):
        return m                                  # single full-extent block
    if n_cores <= 1:
        return block_m                            # 128-aligned; ragged tail masked
    # v7x: largest 128-multiple tile giving >= 2 steps; prefer an exact even split.
    max_tm = min(block_m, (m // (2 * 128)) * 128)
    if max_tm < 128:
        return m
    for tm in range(max_tm, 127, -128):
        steps = -(-m // tm)
        if m % tm == 0 and steps % 2 == 0:
            return tm
    # Fallback: even step count with one (masked) ragged last tile.
    steps = -(-m // max_tm)
    if steps % 2:
        steps += 1
    tm = _round_up(-(-m // steps), 128)
    return max(128, min(tm, max_tm))


@functools.partial(jax.jit, static_argnames=("block_m",))
def sultani_baseline_forward(x, params, *, block_m=1024):
    """x: (B, S, F) bf16 (or f32) -> (B, S, 1) f32 anomaly probabilities."""
    w1, b1, w2, b2, w3, b3 = params
    B, S, F = x.shape
    M = B * S
    x2d = x.reshape(M, F)                       # contiguous reshape, no copy / no cast

    n_cores = _num_tensorcores()
    tm = _row_tile(M, block_m, n_cores)
    grid = (pl.cdiv(M, tm),)                    # ragged last tile masked by Pallas
    const = lambda i: (0, 0)                    # weights/biases: resident block

    flops = 2 * M * (F * H1 + H1 * H2 + H2 * H3)
    bytes_accessed = (M * F * x2d.dtype.itemsize
                      + sum(int(a.size) * a.dtype.itemsize
                            for a in (w1, b1, w2, b2, w3, b3))
                      + M * H3 * 4)
    cost = pl.CostEstimate(flops=flops, transcendentals=M,
                           bytes_accessed=bytes_accessed)

    out = pl.pallas_call(
        _mlp_kernel,
        out_shape=jax.ShapeDtypeStruct((1, M), jnp.float32),   # lane-dense row
        grid_spec=pltpu.PrefetchScalarGridSpec(
            num_scalar_prefetch=0,
            grid=grid,
            in_specs=[
                pl.BlockSpec((tm, F), lambda i: (i, 0)),   # x row tile (bf16)
                pl.BlockSpec((F, H1), const),              # w1 (in, out) bf16
                pl.BlockSpec((1, H1), const),              # b1 f32
                pl.BlockSpec((H1, H2), const),             # w2 (in, out) bf16
                pl.BlockSpec((1, H2), const),              # b2 f32
                pl.BlockSpec((1, H2), const),              # w3 as (1, 32) row, f32
                pl.BlockSpec((1, H3), const),              # b3 f32
            ],
            out_specs=pl.BlockSpec((1, tm), lambda i: (0, i)),
        ),
        compiler_params=pltpu.CompilerParams(
            dimension_semantics=("parallel",)),
        cost_estimate=cost,
    )(x2d, w1, b1, w2, b2, w3, b3)

    return out.reshape(B, S, H3)


def init_params(key, features_length=FEATURES_LENGTH):
    """f32 master parameters matching the PyTorch module.

    PyTorch stores Linear weights as (out, in); fc1/fc2 are kept transposed
    (in, out) for the MXU, fc3 is kept as its (1, 32) row.  Weights use
    Xavier-normal (std = sqrt(2/(fan_in+fan_out))); biases use PyTorch's
    default U(-1/sqrt(fan_in), 1/sqrt(fan_in)).
    """
    ks = jax.random.split(key, 6)

    def xavier(k, fan_in, fan_out):
        std = (2.0 / (fan_in + fan_out)) ** 0.5
        return std * jax.random.normal(k, (fan_in, fan_out), jnp.float32)

    def bias(k, fan_in, fan_out):
        bound = 1.0 / (fan_in ** 0.5)
        return jax.random.uniform(k, (1, fan_out), jnp.float32, -bound, bound)

    w1 = xavier(ks[0], features_length, H1)
    b1 = bias(ks[1], features_length, H1)
    w2 = xavier(ks[2], H1, H2)
    b2 = bias(ks[3], H1, H2)
    w3 = xavier(ks[4], H2, H3).T                 # (1, 32) row (PyTorch (out, in))
    b3 = bias(ks[5], H2, H3)
    return (w1, b1, w2, b2, w3, b3)


def to_kernel_params(params_f32):
    """One-time cast of the matmul weights to bf16 for the MXU (not hot path)."""
    w1, b1, w2, b2, w3, b3 = params_f32
    return (w1.astype(jnp.bfloat16), b1, w2.astype(jnp.bfloat16), b2, w3, b3)


def _reference(x, params_f32):
    """Pure-JAX full-f32 reference (f32 master weights, f32 activations)."""
    w1, b1, w2, b2, w3, b3 = params_f32
    h = jnp.maximum(x.astype(jnp.float32) @ w1 + b1[0], 0.0)
    h = jnp.maximum(h @ w2 + b2[0], 0.0)
    z = h @ w3.T + b3[0]
    return jax.nn.sigmoid(z)


if __name__ == "__main__":
    key = jax.random.PRNGKey(0)
    k_x, k_p = jax.random.split(key)

    batch, segments = 2, 8
    # Upstream feature pipeline supplies bf16 features (no wrapper-side cast).
    x = jax.random.normal(k_x, (batch, segments, FEATURES_LENGTH), jnp.bfloat16)

    params_f32 = init_params(k_p)
    params = to_kernel_params(params_f32)

    out = sultani_baseline_forward(x, params)
    out = jax.block_until_ready(out)

    ref = _reference(x, params_f32)
    assert out.shape == (batch, segments, 1)
    # bf16 x / weights / h1 on the kernel path vs a full-f32 reference.
    max_err = float(jnp.max(jnp.abs(out - ref)))
    assert jnp.allclose(out, ref, atol=3e-2, rtol=0.0), max_err
    assert bool(jnp.all(jnp.isfinite(out)))

    print("KERNEL_OK")
</pallas_src>

<mosaic_0001>
module attributes {stable_mosaic.version = 11 : i64} {
  func.func @_mlp_kernel(%arg0: i32, %arg1: memref<16x256xbf16, #tpu.memory_space<vmem>>, %arg2: memref<256x512xbf16, #tpu.memory_space<vmem>>, %arg3: memref<1x512xf32, #tpu.memory_space<vmem>>, %arg4: memref<512x32xbf16, #tpu.memory_space<vmem>>, %arg5: memref<1x32xf32, #tpu.memory_space<vmem>>, %arg6: memref<1x32xf32, #tpu.memory_space<vmem>>, %arg7: memref<1x1xf32, #tpu.memory_space<vmem>>, %arg8: memref<1x16xf32, #tpu.memory_space<vmem>>) attributes {dimension_semantics = [#tpu.dimension_semantics<parallel>], iteration_bounds = array<i64: 1>, scalar_prefetch = 0 : i64, scratch_operands = 0 : i64, tpu.core_type = #tpu.core_type<tc>, window_params = [{transform_indices = @transform_0, window_bounds = array<i64: 16, 256>}, {pipeline_mode = #tpu.pipeline_mode<synchronous>, transform_indices = @transform_1, window_bounds = array<i64: 256, 512>}, {pipeline_mode = #tpu.pipeline_mode<synchronous>, transform_indices = @transform_2, window_bounds = array<i64: 1, 512>}, {pipeline_mode = #tpu.pipeline_mode<synchronous>, transform_indices = @transform_3, window_bounds = array<i64: 512, 32>}, {pipeline_mode = #tpu.pipeline_mode<synchronous>, transform_indices = @transform_4, window_bounds = array<i64: 1, 32>}, {pipeline_mode = #tpu.pipeline_mode<synchronous>, transform_indices = @transform_5, window_bounds = array<i64: 1, 32>}, {pipeline_mode = #tpu.pipeline_mode<synchronous>, transform_indices = @transform_6, window_bounds = array<i64: 1, 1>}, {transform_indices = @transform_7, window_bounds = array<i64: 1, 16>}]} {
    %c0 = arith.constant 0 : index
    %c0_0 = arith.constant 0 : index
    %0 = vector.load %arg1[%c0, %c0_0] : memref<16x256xbf16, #tpu.memory_space<vmem>>, vector<16x256xbf16>
    %c0_1 = arith.constant 0 : index
    %c0_2 = arith.constant 0 : index
    %1 = vector.load %arg2[%c0_1, %c0_2] : memref<256x512xbf16, #tpu.memory_space<vmem>>, vector<256x512xbf16>
    %cst = arith.constant dense<0.000000e+00> : vector<16x512xf32>
    %2 = tpu.matmul %0, %1, %cst {dimension_numbers = #tpu.dot_dimension_numbers<[1], [0], [0], [1], [0, 0, 1, 1], [], []>} : vector<16x256xbf16>, vector<256x512xbf16>, vector<16x512xf32> -> vector<16x512xf32>
    %c0_3 = arith.constant 0 : index
    %c0_4 = arith.constant 0 : index
    %3 = vector.load %arg3[%c0_3, %c0_4] : memref<1x512xf32, #tpu.memory_space<vmem>>, vector<1x512xf32>
    %4 = vector.broadcast %3 : vector<1x512xf32> to vector<16x512xf32>
    %5 = arith.addf %2, %4 : vector<16x512xf32>
    %cst_5 = arith.constant 0.000000e+00 : f32
    %6 = vector.broadcast %cst_5 : f32 to vector<16x512xf32>
    %7 = arith.maximumf %5, %6 : vector<16x512xf32>
    %8 = arith.truncf %7 : vector<16x512xf32> to vector<16x512xbf16>
    %c0_6 = arith.constant 0 : index
    %c0_7 = arith.constant 0 : index
    %9 = vector.load %arg4[%c0_6, %c0_7] : memref<512x32xbf16, #tpu.memory_space<vmem>>, vector<512x32xbf16>
    %cst_8 = arith.constant dense<0.000000e+00> : vector<16x32xf32>
    %10 = tpu.matmul %8, %9, %cst_8 {dimension_numbers = #tpu.dot_dimension_numbers<[1], [0], [0], [1], [0, 0, 1, 1], [], []>} : vector<16x512xbf16>, vector<512x32xbf16>, vector<16x32xf32> -> vector<16x32xf32>
    %c0_9 = arith.constant 0 : index
    %c0_10 = arith.constant 0 : index
    %11 = vector.load %arg5[%c0_9, %c0_10] : memref<1x32xf32, #tpu.memory_space<vmem>>, vector<1x32xf32>
    %12 = vector.broadcast %11 : vector<1x32xf32> to vector<16x32xf32>
    %13 = arith.addf %10, %12 : vector<16x32xf32>
    %cst_11 = arith.constant 0.000000e+00 : f32
    %14 = vector.broadcast %cst_11 : f32 to vector<16x32xf32>
    %15 = arith.maximumf %13, %14 : vector<16x32xf32>
    %c0_12 = arith.constant 0 : index
    %c0_13 = arith.constant 0 : index
    %16 = vector.load %arg6[%c0_12, %c0_13] : memref<1x32xf32, #tpu.memory_space<vmem>>, vector<1x32xf32>
    %cst_14 = arith.constant dense<0.000000e+00> : vector<1x16xf32>
    %17 = tpu.matmul %16, %15, %cst_14 {dimension_numbers = #tpu.dot_dimension_numbers<[1], [1], [0], [0], [0, 0, 1, 0], [], []>} : vector<1x32xf32>, vector<16x32xf32>, vector<1x16xf32> -> vector<1x16xf32>
    %c0_15 = arith.constant 0 : index
    %c0_16 = arith.constant 0 : index
    %18 = vector.load %arg7[%c0_15, %c0_16] : memref<1x1xf32, #tpu.memory_space<vmem>>, vector<1x1xf32>
    %19 = vector.broadcast %18 : vector<1x1xf32> to vector<1x16xf32>
    %20 = arith.addf %17, %19 : vector<1x16xf32>
    %cst_17 = arith.constant 0.000000e+00 : f32
    %21 = vector.broadcast %cst_17 : f32 to vector<1x16xf32>
    %22 = arith.subf %21, %20 : vector<1x16xf32>
    %23 = math.exp %22 : vector<1x16xf32>
    %cst_18 = arith.constant 1.000000e+00 : f32
    %24 = vector.broadcast %cst_18 : f32 to vector<1x16xf32>
    %25 = arith.addf %24, %23 : vector<1x16xf32>
    %cst_19 = arith.constant 1.000000e+00 : f32
    %26 = vector.broadcast %cst_19 : f32 to vector<1x16xf32>
    %27 = arith.divf %26, %25 : vector<1x16xf32>
    %c0_20 = arith.constant 0 : index
    %c0_21 = arith.constant 0 : index
    %28 = vector.load %arg8[%c0_20, %c0_21] : memref<1x16xf32, #tpu.memory_space<vmem>>, vector<1x16xf32>
    tpu.vector_store %arg8[%c0_20, %c0_21], %27 {strides = array<i32>} : memref<1x16xf32, #tpu.memory_space<vmem>>, vector<1x16xf32>,
    return
  }
  func.func @transform_0(%arg0: i32) -> (i32, i32) {
    %c0_i32 = arith.constant 0 : i32
    %c0_i32_0 = arith.constant 0 : i32
    return %arg0, %c0_i32 : i32, i32
  }
  func.func @transform_1(%arg0: i32) -> (i32, i32) {
    %c0_i32 = arith.constant 0 : i32
    %c0_i32_0 = arith.constant 0 : i32
    %c0_i32_1 = arith.constant 0 : i32
    return %c0_i32, %c0_i32_0 : i32, i32
  }
  func.func @transform_2(%arg0: i32) -> (i32, i32) {
    %c0_i32 = arith.constant 0 : i32
    %c0_i32_0 = arith.constant 0 : i32
    %c0_i32_1 = arith.constant 0 : i32
    return %c0_i32, %c0_i32_0 : i32, i32
  }
  func.func @transform_3(%arg0: i32) -> (i32, i32) {
    %c0_i32 = arith.constant 0 : i32
    %c0_i32_0 = arith.constant 0 : i32
    %c0_i32_1 = arith.constant 0 : i32
    return %c0_i32, %c0_i32_0 : i32, i32
  }
  func.func @transform_4(%arg0: i32) -> (i32, i32) {
    %c0_i32 = arith.constant 0 : i32
    %c0_i32_0 = arith.constant 0 : i32
    %c0_i32_1 = arith.constant 0 : i32
    return %c0_i32, %c0_i32_0 : i32, i32
  }
  func.func @transform_5(%arg0: i32) -> (i32, i32) {
    %c0_i32 = arith.constant 0 : i32
    %c0_i32_0 = arith.constant 0 : i32
    %c0_i32_1 = arith.constant 0 : i32
    return %c0_i32, %c0_i32_0 : i32, i32
  }
  func.func @transform_6(%arg0: i32) -> (i32, i32) {
    %c0_i32 = arith.constant 0 : i32
    %c0_i32_0 = arith.constant 0 : i32
    %c0_i32_1 = arith.constant 0 : i32
    return %c0_i32, %c0_i32_0 : i32, i32
  }
  func.func @transform_7(%arg0: i32) -> (i32, i32) {
    %c0_i32 = arith.constant 0 : i32
    %c0_i32_0 = arith.constant 0 : i32
    return %c0_i32, %arg0 : i32, i32
  }
}

</mosaic_0001>

<bundles_post_ra>
// kernel: sultani_baseline_forward.1
= control target key start
LH: loop header
LB: loop body
LE: loop exit
PB: predicated region body
PF: predicated region fallthrough
CT: control target
= control target key end

     0   :  { %s1523_s0 = inlined_call_operand.vmem [shape: bf16[16,256], index: 0, kind: input, shape index: {}]   ;;  %s1524_s1 = inlined_call_operand.hbm [shape: bf16[256,512], index: 1, kind: input, shape index: {}]   ;;  %s1525_s2 = inlined_call_operand.vmem [shape: f32[1,512], index: 2, kind: input, shape index: {}]   ;;  %s1526_s3 = inlined_call_operand.vmem [shape: bf16[512,32], index: 3, kind: input, shape index: {}]   ;;  %s1527_s4 = inlined_call_operand.vmem [shape: f32[1,32], index: 4, kind: input, shape index: {}]   ;;  %s1528_s5 = inlined_call_operand.vmem [shape: f32[1,32], index: 5, kind: input, shape index: {}]   ;;  %s1529_s6 = inlined_call_operand.<no memory space> [shape: f32[1,1], index: 6, kind: input, shape index: {}]   ;;  %s1530_s7 = inlined_call_operand.vmem [shape: f32[1,16], index: 7, kind: output, shape index: {}]  }
   0x1   :  { %v12_v0 = vstv %s1529_s6 }
   0x2   :  { %13 = vst [vmem:[#allocation2] sm:$0x1] %v12_v0 }
   0x3   :  { %14 = vsyncpa [#allocation4], 0  ;;  %s1337_s26 = smov [#allocation3]   ;;  %s1313_s30 = scalar_lea.hbm %s1524_s1, 8192 }
   0x4   :  { %s22_s27 = sshll.u32 %s1337_s26, 4  ;;  %p1314_p0 = scmp.ne.s32.totalorder %s1524_s1, %s1313_s30  ;;  %s23_s27 = int_to_ptr.vmem [resolvable:$true] %s22_s27 }
   0x5   :  { %p1317_p1 = scmp.lt.u32.totalorder %s1313_s30, %s1524_s1 }
   0x7   :  { %p1319_p2 = pnand %p1317_p1, %p1314_p0 }
   0x9   :  { %1322 = shalt.err (!%p1319_p2)
}
   0xa   :  { %s1323_s6 = scalar_lea.vmem %s23_s27, 8192  ;;  %p1328_p4 = scmp.lt.s32.totalorder %s23_s27, %s23_s27 }
   0xb   :  { %p1324_p3 = scmp.ne.s32.totalorder %s23_s27, %s1323_s6  ;;  %p1329_p5 = scmp.lt.s32.totalorder %s1323_s6, %s1323_s6 }
   0xd   :  { %p1330_p6 = por %p1329_p5, %p1328_p4 }
   0xf   :  { %p1331_p7 = pnand %p1330_p6, %p1324_p3 }
  0x11   :  { %1334 = shalt.err (!%p1331_p7)
}
  0x12   :  { %s1338_s12 = smov 256   ;;  %s1339_s13 = smov 16  }
  0x13   :  { %28 = dma.hbm_to_vmem [thread:$0]  %s1524_s1, 8192, %s23_s27, [#allocation4], %s1338_s12, %s1338_s12, %s1339_s13  }
  0x14   :  { %1335 = dma.done.wait [#allocation4], 8192  }
  0x15   :  { %1336 = vsyncadd [#allocation4], 4294959104  ;;  %v1178_v1 = vld [vmem:[#allocation3 + $0x4] ss:$16 sps:$4 sm:$0xff]   ;;  %v1180_v2 = vld [vmem:[#allocation3 + $0xc] ss:$16 sps:$4 sm:$0xff]  }
  0x16   :  { %461 = vmatprep.subr.bf16.mxu0 %v1178_v1  ;;  %v1182_v3 = vld [vmem:[#allocation3] ss:$16 sps:$4 sm:$0xff]   ;;  %v1183_v4 = vld [vmem:[#allocation3 + $0x8] ss:$16 sps:$4 sm:$0xff]   ;;  %504 = vmatprep.subr.bf16.mxu1 %v1180_v2  ;;  %v1184_v5 = vld [vmem:[#allocation3 + $0x24] ss:$16 sps:$4 sm:$0xff]  }
  0x17   :  { %462 = vmatpush1.bf16.msra.mxu0 %v1182_v3  ;;  %505 = vmatpush1.bf16.msra.mxu1 %v1183_v4  ;;  %v1186_v6 = vld [vmem:[#allocation3 + $0x2c] ss:$16 sps:$4 sm:$0xff]   ;;  %v1188_v7 = vld [vmem:[#allocation3 + $0x20] ss:$16 sps:$4 sm:$0xff]   ;;  %v1189_v8 = vld [vmem:[#allocation3 + $0x28] ss:$16 sps:$4 sm:$0xff]  }
  0x18   :  { %463 = vmatprep.subr.bf16.mxu0 %v1184_v5  ;;  %506 = vmatprep.subr.bf16.mxu1 %v1186_v6  ;;  %v1190_v9 = vld [vmem:[#allocation3 + $0x44] ss:$16 sps:$4 sm:$0xff]   ;;  %v1192_v10 = vld [vmem:[#allocation3 + $0x4c] ss:$16 sps:$4 sm:$0xff]   ;;  %v1194_v11 = vld [vmem:[#allocation3 + $0x40] ss:$16 sps:$4 sm:$0xff]  }
  0x19   :  { %v1195_v12 = vld [vmem:[#allocation3 + $0x48] ss:$16 sps:$4 sm:$0xff]   ;;  %v1196_v13 = vld [vmem:[#allocation3 + $0x64] ss:$16 sps:$4 sm:$0xff]   ;;  %v1198_v14 = vld [vmem:[#allocation3 + $0x6c] ss:$16 sps:$4 sm:$0xff]  }
  0x1a   :  { %v1200_v15 = vld [vmem:[#allocation3 + $0x60] ss:$16 sps:$4 sm:$0xff]   ;;  %v1201_v16 = vld [vmem:[#allocation3 + $0x68] ss:$16 sps:$4 sm:$0xff]   ;;  %v1202_v17 = vld [vmem:[#allocation3 + $0x84] ss:$16 sps:$4 sm:$0xff]  }
  0x1b   :  { %464 = vmatpush1.bf16.msra.mxu0 %v1188_v7  ;;  %507 = vmatpush1.bf16.msra.mxu1 %v1189_v8  ;;  %v1204_v18 = vld [vmem:[#allocation3 + $0x8c] ss:$16 sps:$4 sm:$0xff]   ;;  %v1206_v19 = vld [vmem:[#allocation3 + $0x80] ss:$16 sps:$4 sm:$0xff]   ;;  %v1207_v20 = vld [vmem:[#allocation3 + $0x88] ss:$16 sps:$4 sm:$0xff]  }
  0x1c   :  { %465 = vmatprep.subr.bf16.mxu0 %v1190_v9  ;;  %508 = vmatprep.subr.bf16.mxu1 %v1192_v10  ;;  %v1208_v21 = vld [vmem:[#allocation3 + $0xa4] ss:$16 sps:$4 sm:$0xff]   ;;  %v1210_v22 = vld [vmem:[#allocation3 + $0xac] ss:$16 sps:$4 sm:$0xff]   ;;  %v1212_v23 = vld [vmem:[#allocation3 + $0xa0] ss:$16 sps:$4 sm:$0xff]  }
  0x1d   :  { %v1213_v24 = vld [vmem:[#allocation3 + $0xa8] ss:$16 sps:$4 sm:$0xff]   ;;  %v1214_v25 = vld [vmem:[#allocation3 + $0xc4] ss:$16 sps:$4 sm:$0xff]   ;;  %v1216_v26 = vld [vmem:[#allocation3 + $0xcc] ss:$16 sps:$4 sm:$0xff]  }
  0x1e   :  { %v1218_v27 = vld [vmem:[#allocation3 + $0xc0] ss:$16 sps:$4 sm:$0xff]   ;;  %v1219_v28 = vld [vmem:[#allocation3 + $0xc8] ss:$16 sps:$4 sm:$0xff]   ;;  %v1220_v29 = vld [vmem:[#allocation3 + $0xe4] ss:$16 sps:$4 sm:$0xff]  }
  0x1f   :  { %466 = vmatpush1.bf16.msra.mxu0 %v1194_v11  ;;  %509 = vmatpush1.bf16.msra.mxu1 %v1195_v12  ;;  %v1222_v30 = vld [vmem:[#allocation3 + $0xec] ss:$16 sps:$4 sm:$0xff]   ;;  %v1224_v31 = vld [vmem:[#allocation3 + $0xe0] ss:$16 sps:$4 sm:$0xff]   ;;  %v1225_v32 = vld [vmem:[#allocation3 + $0xe8] ss:$16 sps:$4 sm:$0xff]  }
  0x20   :  { %467 = vmatprep.subr.bf16.mxu0 %v1196_v13  ;;  %510 = vmatprep.subr.bf16.mxu1 %v1198_v14  ;;  %v1226_v33 = vld [vmem:[#allocation3 + $0x104] ss:$16 sps:$4 sm:$0xff]   ;;  %v1228_v34 = vld [vmem:[#allocation3 + $0x10c] ss:$16 sps:$4 sm:$0xff]   ;;  %v1230_v35 = vld [vmem:[#allocation3 + $0x100] ss:$16 sps:$4 sm:$0xff]  }
  0x21   :  { %v1231_v36 = vld [vmem:[#allocation3 + $0x108] ss:$16 sps:$4 sm:$0xff]   ;;  %v1232_v37 = vld [vmem:[#allocation3 + $0x124] ss:$16 sps:$4 sm:$0xff]   ;;  %v1234_v38 = vld [vmem:[#allocation3 + $0x12c] ss:$16 sps:$4 sm:$0xff]  }
  0x22   :  { %v1236_v39 = vld [vmem:[#allocation3 + $0x120] ss:$16 sps:$4 sm:$0xff]   ;;  %v1237_v40 = vld [vmem:[#allocation3 + $0x128] ss:$16 sps:$4 sm:$0xff]   ;;  %v1238_v41 = vld [vmem:[#allocation3 + $0x144] ss:$16 sps:$4 sm:$0xff]  }
  0x23   :  { %468 = vmatpush1.bf16.msra.mxu0 %v1200_v15  ;;  %511 = vmatpush1.bf16.msra.mxu1 %v1201_v16  ;;  %v1240_v42 = vld [vmem:[#allocation3 + $0x14c] ss:$16 sps:$4 sm:$0xff]   ;;  %v1242_v43 = vld [vmem:[#allocation3 + $0x140] ss:$16 sps:$4 sm:$0xff]   ;;  %v1243_v44 = vld [vmem:[#allocation3 + $0x148] ss:$16 sps:$4 sm:$0xff]  }
  0x24   :  { %469 = vmatprep.subr.bf16.mxu0 %v1202_v17  ;;  %512 = vmatprep.subr.bf16.mxu1 %v1204_v18  ;;  %v1244_v45 = vld [vmem:[#allocation3 + $0x164] ss:$16 sps:$4 sm:$0xff]   ;;  %v1246_v46 = vld [vmem:[#allocation3 + $0x16c] ss:$16 sps:$4 sm:$0xff]   ;;  %v1248_v47 = vld [vmem:[#allocation3 + $0x160] ss:$16 sps:$4 sm:$0xff]  }
  0x25   :  { %v1249_v48 = vld [vmem:[#allocation3 + $0x168] ss:$16 sps:$4 sm:$0xff]   ;;  %v1250_v50 = vld [vmem:[#allocation3 + $0x184] ss:$16 sps:$4 sm:$0xff]   ;;  %v1252_v51 = vld [vmem:[#allocation3 + $0x18c] ss:$16 sps:$4 sm:$0xff]  }
  0x26   :  { %v1276_v49 = vld [vmem:[%s1523_s0 + $0x4] ss:$8 sps:$4 sm:$0xff]   ;;  %v1274_v3 = vld [vmem:[%s1523_s0] ss:$8 sps:$4 sm:$0xff]   ;;  %v1285_v11 = vld [vmem:[%s1526_s3 + $0x50] sm:$0xff]   ;;  %vm1341_vm0 = vmmov 0  }
  0x27   :  { %470 = vmatpush1.bf16.msra.mxu0 %v1206_v19  ;;  %513 = vmatpush1.bf16.msra.mxu1 %v1207_v20  ;;  %v1254_v52 = vld [vmem:[#allocation3 + $0x180] ss:$16 sps:$4 sm:$0xff]   ;;  %v1255_v53 = vld [vmem:[#allocation3 + $0x188] ss:$16 sps:$4 sm:$0xff]   ;;  %v1256_v54 = vld [vmem:[#allocation3 + $0x1a4] ss:$16 sps:$4 sm:$0xff]  }
  0x28   :  { %471 = vmatprep.subr.bf16.mxu0 %v1208_v21  ;;  %514 = vmatprep.subr.bf16.mxu1 %v1210_v22  ;;  %v1258_v55 = vld [vmem:[#allocation3 + $0x1ac] ss:$16 sps:$4 sm:$0xff]   ;;  %v1260_v56 = vld [vmem:[#allocation3 + $0x1a0] ss:$16 sps:$4 sm:$0xff]   ;;  %v1261_v57 = vld [vmem:[#allocation3 + $0x1a8] ss:$16 sps:$4 sm:$0xff]  }
  0x29   :  { %493 = vmatprep.mubr.bf16.mxu0 %v1276_v49  ;;  %536 = vmatprep.mubr.bf16.mxu1 %v1276_v49  ;;  %v1262_v58 = vld [vmem:[#allocation3 + $0x1c4] ss:$16 sps:$4 sm:$0xff]   ;;  %v1264_v59 = vld [vmem:[#allocation3 + $0x1cc] ss:$16 sps:$4 sm:$0xff]   ;;  %v1266_v60 = vld [vmem:[#allocation3 + $0x1c0] ss:$16 sps:$4 sm:$0xff]  }
  0x2a   :  { %v1267_v61 = vld [vmem:[#allocation3 + $0x1c8] ss:$16 sps:$4 sm:$0xff]   ;;  %v1268_v62 = vld [vmem:[#allocation3 + $0x1e4] ss:$16 sps:$4 sm:$0xff]   ;;  %v1270_v63 = vld [vmem:[#allocation3 + $0x1ec] ss:$16 sps:$4 sm:$0xff]  }
  0x2b   :  { %472 = vmatpush1.bf16.msra.mxu0 %v1212_v23  ;;  %515 = vmatpush1.bf16.msra.mxu1 %v1213_v24  ;;  %v1272_v0 = vld [vmem:[#allocation3 + $0x1e0] ss:$16 sps:$4 sm:$0xff]   ;;  %v1273_v1 = vld [vmem:[#allocation3 + $0x1e8] ss:$16 sps:$4 sm:$0xff]   ;;  %vm917_vm1 = vcmask 261120   ;;  %vm1003_vm3 = vcmask 122880  }
  0x2c   :  { %473 = vmatprep.subr.bf16.mxu0 %v1214_v25  ;;  %516 = vmatprep.subr.bf16.mxu1 %v1216_v26  ;;  %v1277_v2 = vld [vmem:[%s1526_s3 + $0x40] sm:$0xff]   ;;  %v1281_v7 = vld [vmem:[%s1526_s3 + $0x48] sm:$0xff]   ;;  %v1286_v12 = vld [vmem:[%s1526_s3 + $0xd0] sm:$0xff]  }
  0x2d   :  { %v1278_v4 = vld [vmem:[%s1526_s3 + $0xc0] sm:$0xff]   ;;  %v1282_v8 = vld [vmem:[%s1526_s3 + $0xc8] sm:$0xff]   ;;  %v1287_v13 = vld [vmem:[%s1526_s3 + $0x10] sm:$0xff]  }
  0x2e   :  { %v1279_v5 = vld [vmem:[%s1526_s3] sm:$0xff]   ;;  %v1283_v9 = vld [vmem:[%s1526_s3 + $0x8] sm:$0xff]   ;;  %v1288_v14 = vld [vmem:[%s1526_s3 + $0x90] sm:$0xff]  }
  0x2f   :  { %474 = vmatpush1.bf16.msra.mxu0 %v1218_v27  ;;  %517 = vmatpush1.bf16.msra.mxu1 %v1219_v28  ;;  %v1280_v6 = vld [vmem:[%s1526_s3 + $0x80] sm:$0xff]   ;;  %v1284_v10 = vld [vmem:[%s1526_s3 + $0x88] sm:$0xff]   ;;  %v1289_v15 = vld [vmem:[%s1526_s3 + $0x58] sm:$0xff]  }
  0x30   :  { %475 = vmatprep.subr.bf16.mxu0 %v1220_v29  ;;  %518 = vmatprep.subr.bf16.mxu1 %v1222_v30  ;;  %v1290_v16 = vld [vmem:[%s1526_s3 + $0xd8] sm:$0xff]   ;;  %v1293_v19 = vld [vmem:[%s1526_s3 + $0x60] sm:$0xff]   ;;  %v1297_v23 = vld [vmem:[%s1526_s3 + $0x68] sm:$0xff]  }
  0x31   :  { %v1291_v17 = vld [vmem:[%s1526_s3 + $0x18] sm:$0xff]   ;;  %v1294_v20 = vld [vmem:[%s1526_s3 + $0xe0] sm:$0xff]   ;;  %v1298_v24 = vld [vmem:[%s1526_s3 + $0xe8] sm:$0xff]  }
  0x32   :  { %v1292_v18 = vld [vmem:[%s1526_s3 + $0x98] sm:$0xff]   ;;  %v1295_v21 = vld [vmem:[%s1526_s3 + $0x20] sm:$0xff]   ;;  %v1299_v25 = vld [vmem:[%s1526_s3 + $0x28] sm:$0xff]  }
  0x33   :  { %476 = vmatpush1.bf16.msra.mxu0 %v1224_v31  ;;  %519 = vmatpush1.bf16.msra.mxu1 %v1225_v32  ;;  %v1296_v22 = vld [vmem:[%s1526_s3 + $0xa0] sm:$0xff]   ;;  %v1300_v26 = vld [vmem:[%s1526_s3 + $0xa8] sm:$0xff]   ;;  %v1301_v27 = vld [vmem:[%s1526_s3 + $0x70] sm:$0xff]  }
  0x34   :  { %477 = vmatprep.subr.bf16.mxu0 %v1226_v33  ;;  %520 = vmatprep.subr.bf16.mxu1 %v1228_v34  ;;  %v1302_v28 = vld [vmem:[%s1526_s3 + $0xf0] sm:$0xff]   ;;  %v1305_v31 = vld [vmem:[%s1526_s3 + $0x78] sm:$0xff]   ;;  %vm1168_vm2 = vmpackc.low %vm917_vm1, %vm917_vm1 }
  0x35   :  { %v1303_v29 = vld [vmem:[%s1526_s3 + $0x30] sm:$0xff]   ;;  %v1306_v32 = vld [vmem:[%s1526_s3 + $0xf8] sm:$0xff]  }
  0x36   :  { %v1304_v30 = vld [vmem:[%s1526_s3 + $0xb0] sm:$0xff]   ;;  %v1307_v33 = vld [vmem:[%s1526_s3 + $0x38] sm:$0xff]  }
  0x37   :  { %478 = vmatpush1.bf16.msra.mxu0 %v1230_v35  ;;  %521 = vmatpush1.bf16.msra.mxu1 %v1231_v36  ;;  %v1308_v34 = vld [vmem:[%s1526_s3 + $0xb8] sm:$0xff]   ;;  %v111_v35 = vlaneseq }
  0x38   :  { %479 = vmatprep.subr.bf16.mxu0 %v1232_v37  ;;  %522 = vmatprep.subr.bf16.mxu1 %v1234_v38 }
  0x39   :  { %v1501_v36 = vshrl.u32 %v111_v35, 7 }
  0x3b   :  { %480 = vmatpush1.bf16.msra.mxu0 %v1236_v39  ;;  %523 = vmatpush1.bf16.msra.mxu1 %v1237_v40  ;;  %v113_v37 = vsub.s32 0, %v1501_v36  ;;  %v121_v38 = vsub.s32 2, %v1501_v36  ;;  %v109_v39 = vld [vmem:[%s1525_s2] sm:$0xf]  ;;  %v117_v40 = vsub.s32 1, %v1501_v36 }
  0x3c   :  { %481 = vmatprep.subr.bf16.mxu0 %v1238_v41  ;;  %524 = vmatprep.subr.bf16.mxu1 %v1240_v42  ;;  %v125_v41 = vsub.s32 3, %v1501_v36 }
  0x3d   :  { %v114_v42 = vrot.slane %v109_v39, %v113_v37 }
  0x3f   :  { %482 = vmatpush1.bf16.msra.mxu0 %v1242_v43  ;;  %525 = vmatpush1.bf16.msra.mxu1 %v1243_v44  ;;  %v122_v43 = vrot.slane %v109_v39, %v121_v38  ;;  %v118_v44 = vrot.slane %v109_v39, %v117_v40 }
  0x40   :  { %483 = vmatprep.subr.bf16.mxu0 %v1244_v45  ;;  %526 = vmatprep.subr.bf16.mxu1 %v1246_v46  ;;  %v126_v45 = vrot.slane %v109_v39, %v125_v41 }
  0x43   :  { %484 = vmatpush1.bf16.msra.mxu0 %v1248_v47  ;;  %527 = vmatpush1.bf16.msra.mxu1 %v1249_v48 }
  0x44   :  { %485 = vmatprep.subr.bf16.mxu0 %v1250_v50  ;;  %528 = vmatprep.subr.bf16.mxu1 %v1252_v51 }
  0x47   :  { %486 = vmatpush1.bf16.msra.mxu0 %v1254_v52  ;;  %529 = vmatpush1.bf16.msra.mxu1 %v1255_v53 }
  0x48   :  { %487 = vmatprep.subr.bf16.mxu0 %v1256_v54  ;;  %530 = vmatprep.subr.bf16.mxu1 %v1258_v55 }
  0x4b   :  { %488 = vmatpush1.bf16.msra.mxu0 %v1260_v56  ;;  %531 = vmatpush1.bf16.msra.mxu1 %v1261_v57 }
  0x4c   :  { %489 = vmatprep.subr.bf16.mxu0 %v1262_v58  ;;  %532 = vmatprep.subr.bf16.mxu1 %v1264_v59 }
  0x4f   :  { %490 = vmatpush1.bf16.msra.mxu0 %v1266_v60  ;;  %533 = vmatpush1.bf16.msra.mxu1 %v1267_v61 }
  0x50   :  { %491 = vmatprep.subr.bf16.mxu0 %v1268_v62  ;;  %534 = vmatprep.subr.bf16.mxu1 %v1270_v63 }
  0x53   :  { %492 = vmatpush1.bf16.msra.mxu0 %v1272_v0  ;;  %535 = vmatpush1.bf16.msra.mxu1 %v1273_v1 }
  0x54   :  { %1112 = vmatprep.subr.bf16.mxu0 %v1277_v2  ;;  %1134 = vmatprep.subr.bf16.mxu1 %v1278_v4 }
  0x56   :  { %494 = vmatmul.mubr.bf16.vlgmr.msra.gmra.mrb[0].mxu0 %v1274_v3  ;;  %537 = vmatmul.mubr.bf16.vlgmr.msra.gmra.mrb[0].mxu1 %v1274_v3 }
  0x57   :  { %1113 = vmatpush3.bf16.msra.mxu0 %v1279_v5  ;;  %1135 = vmatpush3.bf16.msra.mxu1 %v1280_v6 }
  0x58   :  { %1114 = vmatprep.subr.bf16.mxu0 %v1281_v7  ;;  %1136 = vmatprep.subr.bf16.mxu1 %v1282_v8 }
  0x5b   :  { %1115 = vmatpush3.bf16.msra.mxu0 %v1283_v9  ;;  %1137 = vmatpush3.bf16.msra.mxu1 %v1284_v10  ;;  %v1340_v10 = vmov 0.0|0.0  }
  0x5c   :  { %1116 = vmatprep.subr.bf16.mxu0 %v1285_v11  ;;  %1138 = vmatprep.subr.bf16.mxu1 %v1286_v12  ;;  %v1342_v11 = vmov 0.0   ;;  %v907_v12 = vld [vmem:[#allocation2] sm:$0x1] }
  0x5f   :  { %1117 = vmatpush3.bf16.msra.mxu0 %v1287_v13  ;;  %1139 = vmatpush3.bf16.msra.mxu1 %v1288_v14  ;;  %v1343_v13 = vmov 0  }
  0x60   :  { %1118 = vmatprep.subr.bf16.mxu0 %v1289_v15  ;;  %1140 = vmatprep.subr.bf16.mxu1 %v1290_v16  ;;  %v1076_v16 = vld [vmem:[%s1527_s4] ss:$0 sm:$0xff] }
  0x61   :  { %1177 = vset.pattern.permute.xlu0 %v1343_v13 }
  0x62   :  { %910 = vperm.xlu0 %1177, %v907_v12  }
  0x63   :  { %1119 = vmatpush3.bf16.msra.mxu0 %v1291_v17  ;;  %1141 = vmatpush3.bf16.msra.mxu1 %v1292_v18 }
  0x64   :  { %1120 = vmatprep.subr.bf16.mxu0 %v1293_v19  ;;  %1142 = vmatprep.subr.bf16.mxu1 %v1294_v20 }
  0x67   :  { %1121 = vmatpush3.bf16.msra.mxu0 %v1295_v21  ;;  %1143 = vmatpush3.bf16.msra.mxu1 %v1296_v22 }
  0x68   :  { %1122 = vmatprep.subr.bf16.mxu0 %v1297_v23  ;;  %1144 = vmatprep.subr.bf16.mxu1 %v1298_v24 }
  0x6b   :  { %1123 = vmatpush3.bf16.msra.mxu0 %v1299_v25  ;;  %1145 = vmatpush3.bf16.msra.mxu1 %v1300_v26 }
  0x6c   :  { %1124 = vmatprep.subr.bf16.mxu0 %v1301_v27  ;;  %1146 = vmatprep.subr.bf16.mxu1 %v1302_v28 }
  0x6f   :  { %1125 = vmatpush3.bf16.msra.mxu0 %v1303_v29  ;;  %1147 = vmatpush3.bf16.msra.mxu1 %v1304_v30 }
  0x70   :  { %1126 = vmatprep.subr.bf16.mxu0 %v1305_v31  ;;  %1148 = vmatprep.subr.bf16.mxu1 %v1306_v32 }
  0x73   :  { %1127 = vmatpush3.bf16.msra.mxu0 %v1307_v33  ;;  %1149 = vmatpush3.bf16.msra.mxu1 %v1308_v34  ;;  %v906_v34 = vld [vmem:[%s1528_s5] sm:$0x1] }
  0x74   :  { %1166 = vmatprep.subr.bf16.mxu0 %v1340_v10 }
  0xe1   :  { %v911_v35 = vpop.permute.xlu0 %910 }
  0xe2   :  { %v916_v38 = vrot.slane %v911_v35, %v113_v37 }
 0x129   :  { %v495_v46 = vpop.f32.mrb[0].mxu0  ;;  %v538_v47 = vpop.f32.mrb[0].mxu1 }
 0x12a   :  { %v496_v48 = vadd.f32 %v495_v46, %v114_v42  ;;  %v539_v49 = vadd.f32 %v538_v47, %v122_v43  ;;  %v497_v50 = vpop.f32.mrb[1].mxu0  ;;  %v540_v51 = vpop.f32.mrb[1].mxu1 }
 0x12b   :  { %v498_v52 = vadd.f32 %v497_v50, %v118_v44  ;;  %v541_v53 = vadd.f32 %v540_v51, %v126_v45  ;;  %v499_v54 = vpop.f32.mrb[2].mxu0  ;;  %v542_v55 = vpop.f32.mrb[2].mxu1 }
 0x12c   :  { %v549_v56 = vmax.f32 %v539_v49, 0.0  ;;  %v500_v57 = vadd.f32 %v499_v54, %v114_v42  ;;  %v543_v58 = vadd.f32 %v542_v55, %v122_v43  ;;  %v501_v59 = vpop.f32.mrb[3].mxu0  ;;  %v544_v60 = vpop.f32.mrb[3].mxu1  ;;  %v547_v0 = vmax.f32 %v496_v48, 0.0 }
 0x12d   :  { %v550_v61 = vmax.f32 %v541_v53, 0.0  ;;  %v502_v62 = vadd.f32 %v501_v59, %v118_v44  ;;  %v545_v63 = vadd.f32 %v544_v60, %v126_v45  ;;  %v548_v3 = vmax.f32 %v498_v52, 0.0 }
 0x12e   :  { %v551_v1 = vmax.f32 %v500_v57, 0.0  ;;  %v553_v2 = vmax.f32 %v543_v58, 0.0 }
 0x12f   :  { %v552_v4 = vmax.f32 %v502_v62, 0.0  ;;  %v554_v5 = vmax.f32 %v545_v63, 0.0 }
 0x130   :  { %v555_v6 = vpack.c.bf16 %v551_v1, %v547_v0  ;;  %v557_v7 = vpack.c.bf16 %v553_v2, %v549_v56 }
 0x131   :  { %v556_v8 = vpack.c.bf16 %v552_v4, %v548_v3  ;;  %v558_v9 = vpack.c.bf16 %v554_v5, %v550_v61 }
 0x133   :  { %854 = vmatprep.mubr.bf16.mxu0 %v556_v8  ;;  %895 = vmatprep.mubr.bf16.mxu1 %v558_v9 }
 0x134   :  { %855 = vmatmul.mubr.bf16.vlgmr.msra.gmra.mrb[4].mxu0 %v555_v6  ;;  %896 = vmatmul.mubr.bf16.vlgmr.msra.gmra.mrb[4].mxu1 %v557_v7 }
 0x135   :  { %1163 = vmatprep.mubr.msk.f32.mxu0 %vm1341_vm0, %v1342_v11 }
 0x207   :  { %v1128_v14 = vpop.f32.mrb[4].mxu0  ;;  %v1150_v15 = vpop.f32.mrb[4].mxu1 }
 0x208   :  { %v1129_v17 = vpop.f32.mrb[5].mxu0  ;;  %v1151_v18 = vpop.f32.mrb[5].mxu1 }
 0x209   :  { %v1130_v19 = vadd.f32 %v1129_v17, %v1128_v14  ;;  %v1152_v20 = vadd.f32 %v1151_v18, %v1150_v15  ;;  %v1131_v21 = vpop.f32.mrb[6].mxu0  ;;  %v1153_v22 = vpop.f32.mrb[6].mxu1 }
 0x20a   :  { %v1132_v23 = vpop.f32.mrb[7].mxu0  ;;  %v1154_v24 = vpop.f32.mrb[7].mxu1 }
 0x20b   :  { %v857_v25 = vadd.f32 %v1130_v19, %v1076_v16  ;;  %v1133_v26 = vadd.f32 %v1132_v23, %v1131_v21  ;;  %v1155_v27 = vadd.f32 %v1154_v24, %v1153_v22 }
 0x20d   :  { %v898_v28 = vadd.f32 %v1152_v20, %v857_v25  ;;  %v860_v29 = vadd.f32 %v1133_v26, %v1076_v16 }
 0x20f   :  { %v901_v30 = vadd.f32 %v1155_v27, %v860_v29  ;;  %v904_v31 = vmax.f32 %v898_v28, 0.0 }
 0x211   :  { %v905_v32 = vmax.f32 %v901_v30, 0.0 }
 0x213   :  { %v1167_v33 = vpack.c.bf16 %v905_v32, %v904_v31 }
 0x215   :  { %1169 = vmatpush3.bf16.xpose.msk.msra.mxu0 %vm1168_vm2, %v1167_v33 }
 0x21c   :  { %1164 = vmatmul.mubr.msk.f32.vlgmr.msra.gmra.mrb[8].mxu0 %vm917_vm1, %v906_v34 }
 0x2ef   :  { %v993_v39 = vpop.f32.mrb[8].mxu0 }
 0x2f0   :  { %v994_v40 = vadd.f32 %v993_v39, %v916_v38  ;;  %v1165_v41 = vpop.f32.mrb[9].mxu0 }
 0x2f2   :  { %v997_v42 = vsub.f32 0.0, %v994_v40 }
 0x2f4   :  { %v998_v43 = vmul.f32 1.442695, %v997_v42 }
 0x2f6   :  { %1309 = vpow2.f32 %v998_v43 }
 0x300   :  { %v1310_v44 = vpop.eup %1309 }
 0x301   :  { %v1000_v45 = vadd.f32 1.0, %v1310_v44 }
 0x303   :  { %1311 = vrcp.f32 %v1000_v45 }
 0x30d   :  { %v1312_v46 = vpop.eup %1311 }
 0x30e   :  { %1004 = vst.msk [vmem:[%s1530_s7] sm:$0x1] %vm1003_vm3, %v1312_v46 }
 0x30f   :  { %1009 = vsyncpa [#allocation4], 1 }

</bundles_post_ra>
